<compile_context>
chip_gen: v7x
topology: tpu7x:2x2x1
jax: 0.10.0
libtpu: 0.0.40
codegen_flags: <defaults>
</compile_context>

<pallas_src>
import functools

import jax
import jax.numpy as jnp
import numpy as np
from jax.experimental import pallas as pl
from jax.experimental.pallas import tpu as pltpu


def _cam_kernel(x_ref, w1t_ref, b1_ref, w2t_ref, b2_ref, o_ref, *, inv_hw):
    """One block of Bn batch samples per grid step.

    x_ref   : (Bn, C, HW)  input slab, channels on sublanes, H*W on lanes
    w1t_ref : (C, Ch)      conv1by1 weight, transposed   (Ch = C // 16)
    b1_ref  : (1, Ch)      conv1by1 bias
    w2t_ref : (Ch, C)      conv1by1_2 weight, transposed
    b2_ref  : (1, C)       conv1by1_2 bias
    o_ref   : (Bn, C, HW)
    """
    x = x_ref[...]                                   # (Bn, C, HW)
    bn = x.shape[0]
    xf = x.astype(jnp.float32)

    # Global spatial pooling: reductions over the lane axis (XLU).
    mx = jnp.max(xf, axis=2)                         # (Bn, C)
    av = jnp.sum(xf, axis=2) * inv_hw                # (Bn, C)

    # Fused MLP over both branches: stack pooled rows -> one matmul pair.
    p = jnp.concatenate([mx, av], axis=0)            # (2*Bn, C)
    h = jnp.dot(p, w1t_ref[...],
                preferred_element_type=jnp.float32) + b1_ref[...]   # (2*Bn, Ch)
    h = jnp.maximum(h, 0.0)                                          # ReLU
    z = jnp.dot(h, w2t_ref[...],
                preferred_element_type=jnp.float32) + b2_ref[...]   # (2*Bn, C)

    gate = jax.nn.sigmoid(z[:bn] + z[bn:])           # (Bn, C), f32

    # Channel attention: broadcast (Bn, C, 1) gate over the H*W lanes.
    o_ref[...] = (xf * gate[:, :, None]).astype(o_ref.dtype)


def channel_attention_cam(x_nchw, w1, b1, w2, b2, *, target_block_bytes=2 << 20):
    """x_nchw: (N, C, H, W); w1: (C//16, C); b1: (C//16,); w2: (C, C//16); b2: (C,)."""
    N, C, H, W = x_nchw.shape
    Ch = w1.shape[0]
    HW = H * W

    # Free view: NCHW is contiguous, so (N, C, H*W) needs no data movement.
    x = x_nchw.reshape(N, C, HW)

    # Pick how many samples to pack per grid step so one block is ~2 MiB
    # (amortizes the ~0.35 us per-step pipeline overhead), capped at N, and
    # dividing N evenly so the grid has no ragged tail.
    per_sample_bytes = C * HW * x.dtype.itemsize
    bn = int(max(1, min(N, target_block_bytes // max(per_sample_bytes, 1))))
    while N % bn:
        bn -= 1
    steps = N // bn

    kernel = functools.partial(_cam_kernel, inv_hw=1.0 / HW)

    out = pl.pallas_call(
        kernel,
        out_shape=jax.ShapeDtypeStruct((N, C, HW), x.dtype),
        grid_spec=pltpu.PrefetchScalarGridSpec(
            num_scalar_prefetch=0,
            grid=(steps,),
            in_specs=[
                pl.BlockSpec((bn, C, HW), lambda n: (n, 0, 0)),
                pl.BlockSpec((C, Ch), lambda n: (0, 0)),
                pl.BlockSpec((1, Ch), lambda n: (0, 0)),
                pl.BlockSpec((Ch, C), lambda n: (0, 0)),
                pl.BlockSpec((1, C), lambda n: (0, 0)),
            ],
            out_specs=pl.BlockSpec((bn, C, HW), lambda n: (n, 0, 0)),
        ),
        compiler_params=pltpu.CompilerParams(
            dimension_semantics=("parallel",),
            vmem_limit_bytes=64 << 20,
        ),
    )(
        x,
        jnp.transpose(w1),          # (C, Ch)
        b1.reshape(1, Ch),
        jnp.transpose(w2),          # (Ch, C)
        b2.reshape(1, C),
    )

    return out.reshape(N, C, H, W)


def _ref_forward(x, w1, b1, w2, b2):
    """Pure-JAX reference matching the PyTorch forward (NCHW)."""
    mx = jnp.max(x, axis=(2, 3))    # (N, C)
    av = jnp.mean(x, axis=(2, 3))   # (N, C)

    def mlp(p):  # (N, C) -> (N, C)
        h = jnp.maximum(p @ w1.T + b1[None, :], 0.0)
        return h @ w2.T + b2[None, :]

    gate = jax.nn.sigmoid(mlp(mx) + mlp(av))           # (N, C)
    return gate[:, :, None, None] * x


if __name__ == "__main__":
    # Small shapes consistent with the module.  channels must be >= 16 so that
    # channels // 16 >= 1 (hidden width of the 1x1-conv bottleneck).
    N, C, H, W = 2, 64, 16, 16
    Ch = C // 16  # = 4

    key = jax.random.PRNGKey(0)
    kx, k1, kb1, k2, kb2 = jax.random.split(key, 5)

    x = jax.random.normal(kx, (N, C, H, W), jnp.float32)
    # PyTorch Conv2d 1x1 weights are (out, in, 1, 1); kept here as (out, in).
    w1 = 0.1 * jax.random.normal(k1, (Ch, C), jnp.float32)
    b1 = 0.1 * jax.random.normal(kb1, (Ch,), jnp.float32)
    w2 = 0.1 * jax.random.normal(k2, (C, Ch), jnp.float32)
    b2 = 0.1 * jax.random.normal(kb2, (C,), jnp.float32)

    out = channel_attention_cam(x, w1, b1, w2, b2)
    out = jax.block_until_ready(out)

    ref = _ref_forward(x, w1, b1, w2, b2)
    np.testing.assert_allclose(np.asarray(out), np.asarray(ref),
                               rtol=1e-5, atol=1e-5)
    assert out.shape == (N, C, H, W)
    print("KERNEL_OK")
</pallas_src>

<mosaic_0001>
module attributes {stable_mosaic.version = 11 : i64} {
  func.func @_cam_kernel(%arg0: i32, %arg1: memref<2x64x256xf32, #tpu.memory_space<vmem>>, %arg2: memref<64x4xf32, #tpu.memory_space<vmem>>, %arg3: memref<1x4xf32, #tpu.memory_space<vmem>>, %arg4: memref<4x64xf32, #tpu.memory_space<vmem>>, %arg5: memref<1x64xf32, #tpu.memory_space<vmem>>, %arg6: memref<2x64x256xf32, #tpu.memory_space<vmem>>) attributes {dimension_semantics = [#tpu.dimension_semantics<parallel>], iteration_bounds = array<i64: 1>, scalar_prefetch = 0 : i64, scratch_operands = 0 : i64, tpu.core_type = #tpu.core_type<tc>, window_params = [{transform_indices = @transform_0, window_bounds = array<i64: 2, 64, 256>}, {pipeline_mode = #tpu.pipeline_mode<synchronous>, transform_indices = @transform_1, window_bounds = array<i64: 64, 4>}, {pipeline_mode = #tpu.pipeline_mode<synchronous>, transform_indices = @transform_2, window_bounds = array<i64: 1, 4>}, {pipeline_mode = #tpu.pipeline_mode<synchronous>, transform_indices = @transform_3, window_bounds = array<i64: 4, 64>}, {pipeline_mode = #tpu.pipeline_mode<synchronous>, transform_indices = @transform_4, window_bounds = array<i64: 1, 64>}, {transform_indices = @transform_5, window_bounds = array<i64: 2, 64, 256>}]} {
    %c0 = arith.constant 0 : index
    %c0_0 = arith.constant 0 : index
    %c0_1 = arith.constant 0 : index
    %0 = vector.load %arg1[%c0, %c0_0, %c0_1] : memref<2x64x256xf32, #tpu.memory_space<vmem>>, vector<2x64x256xf32>
    %cst = arith.constant dense<0xFF800000> : vector<2x64xf32>
    %1 = vector.multi_reduction <maximumf>, %0, %cst [2] : vector<2x64x256xf32> to vector<2x64xf32>
    %cst_2 = arith.constant dense<0.000000e+00> : vector<2x64xf32>
    %2 = vector.multi_reduction <add>, %0, %cst_2 [2] : vector<2x64x256xf32> to vector<2x64xf32>
    %cst_3 = arith.constant 3.906250e-03 : f32
    %3 = vector.broadcast %cst_3 : f32 to vector<2x64xf32>
    %4 = arith.mulf %2, %3 : vector<2x64xf32>
    %5 = tpu.concatenate %1, %4 in 0 : vector<2x64xf32>, vector<2x64xf32> -> vector<4x64xf32>
    %c0_4 = arith.constant 0 : index
    %c0_5 = arith.constant 0 : index
    %6 = vector.load %arg2[%c0_4, %c0_5] : memref<64x4xf32, #tpu.memory_space<vmem>>, vector<64x4xf32>
    %cst_6 = arith.constant dense<0.000000e+00> : vector<4x4xf32>
    %7 = tpu.matmul %5, %6, %cst_6 {dimension_numbers = #tpu.dot_dimension_numbers<[1], [0], [0], [1], [0, 0, 1, 1], [], []>} : vector<4x64xf32>, vector<64x4xf32>, vector<4x4xf32> -> vector<4x4xf32>
    %c0_7 = arith.constant 0 : index
    %c0_8 = arith.constant 0 : index
    %8 = vector.load %arg3[%c0_7, %c0_8] : memref<1x4xf32, #tpu.memory_space<vmem>>, vector<1x4xf32>
    %9 = vector.broadcast %8 : vector<1x4xf32> to vector<4x4xf32>
    %10 = arith.addf %7, %9 : vector<4x4xf32>
    %cst_9 = arith.constant 0.000000e+00 : f32
    %11 = vector.broadcast %cst_9 : f32 to vector<4x4xf32>
    %12 = arith.maximumf %10, %11 : vector<4x4xf32>
    %c0_10 = arith.constant 0 : index
    %c0_11 = arith.constant 0 : index
    %13 = vector.load %arg4[%c0_10, %c0_11] : memref<4x64xf32, #tpu.memory_space<vmem>>, vector<4x64xf32>
    %cst_12 = arith.constant dense<0.000000e+00> : vector<4x64xf32>
    %14 = tpu.matmul %12, %13, %cst_12 {dimension_numbers = #tpu.dot_dimension_numbers<[1], [0], [0], [1], [0, 0, 1, 1], [], []>} : vector<4x4xf32>, vector<4x64xf32>, vector<4x64xf32> -> vector<4x64xf32>
    %c0_13 = arith.constant 0 : index
    %c0_14 = arith.constant 0 : index
    %15 = vector.load %arg5[%c0_13, %c0_14] : memref<1x64xf32, #tpu.memory_space<vmem>>, vector<1x64xf32>
    %16 = vector.broadcast %15 : vector<1x64xf32> to vector<4x64xf32>
    %17 = arith.addf %14, %16 : vector<4x64xf32>
    %18 = vector.extract_strided_slice %17 {offsets = [0, 0], sizes = [2, 64], strides = [1, 1]} : vector<4x64xf32> to vector<2x64xf32>
    %19 = vector.extract_strided_slice %17 {offsets = [2, 0], sizes = [2, 64], strides = [1, 1]} : vector<4x64xf32> to vector<2x64xf32>
    %20 = arith.addf %18, %19 : vector<2x64xf32>
    %21 = arith.negf %20 : vector<2x64xf32>
    %22 = math.exp %21 : vector<2x64xf32>
    %cst_15 = arith.constant 1.000000e+00 : f32
    %23 = vector.broadcast %cst_15 : f32 to vector<2x64xf32>
    %24 = arith.addf %23, %22 : vector<2x64xf32>
    %25 = arith.divf %23, %24 : vector<2x64xf32>
    %26 = vector.shape_cast %25 : vector<2x64xf32> to vector<2x64x1xf32>
    %27 = vector.broadcast %26 : vector<2x64x1xf32> to vector<2x64x256xf32>
    %28 = arith.mulf %0, %27 : vector<2x64x256xf32>
    %c0_16 = arith.constant 0 : index
    %c0_17 = arith.constant 0 : index
    %c0_18 = arith.constant 0 : index
    %29 = vector.load %arg6[%c0_16, %c0_17, %c0_18] : memref<2x64x256xf32, #tpu.memory_space<vmem>>, vector<2x64x256xf32>
    tpu.vector_store %arg6[%c0_16, %c0_17, %c0_18], %28 {strides = array<i32>} : memref<2x64x256xf32, #tpu.memory_space<vmem>>, vector<2x64x256xf32>,
    return
  }
  func.func @transform_0(%arg0: i32) -> (i32, i32, i32) {
    %c0_i32 = arith.constant 0 : i32
    %c0_i32_0 = arith.constant 0 : i32
    %c0_i32_1 = arith.constant 0 : i32
    return %arg0, %c0_i32, %c0_i32_0 : i32, i32, i32
  }
  func.func @transform_1(%arg0: i32) -> (i32, i32) {
    %c0_i32 = arith.constant 0 : i32
    %c0_i32_0 = arith.constant 0 : i32
    %c0_i32_1 = arith.constant 0 : i32
    return %c0_i32, %c0_i32_0 : i32, i32
  }
  func.func @transform_2(%arg0: i32) -> (i32, i32) {
    %c0_i32 = arith.constant 0 : i32
    %c0_i32_0 = arith.constant 0 : i32
    %c0_i32_1 = arith.constant 0 : i32
    return %c0_i32, %c0_i32_0 : i32, i32
  }
  func.func @transform_3(%arg0: i32) -> (i32, i32) {
    %c0_i32 = arith.constant 0 : i32
    %c0_i32_0 = arith.constant 0 : i32
    %c0_i32_1 = arith.constant 0 : i32
    return %c0_i32, %c0_i32_0 : i32, i32
  }
  func.func @transform_4(%arg0: i32) -> (i32, i32) {
    %c0_i32 = arith.constant 0 : i32
    %c0_i32_0 = arith.constant 0 : i32
    %c0_i32_1 = arith.constant 0 : i32
    return %c0_i32, %c0_i32_0 : i32, i32
  }
  func.func @transform_5(%arg0: i32) -> (i32, i32, i32) {
    %c0_i32 = arith.constant 0 : i32
    %c0_i32_0 = arith.constant 0 : i32
    %c0_i32_1 = arith.constant 0 : i32
    return %arg0, %c0_i32, %c0_i32_0 : i32, i32, i32
  }
}

</mosaic_0001>

<bundles_post_ra>
// kernel: tpu_custom_call.1
= control target key start
LH: loop header
LB: loop body
LE: loop exit
PB: predicated region body
PF: predicated region fallthrough
CT: control target
= control target key end

     0   :  { %10 = vsyncpa [#allocation3], 0  ;;  %s1377_s0 = inlined_call_operand.hbm [shape: f32[2,64,256], index: 0, kind: input, shape index: {}]   ;;  %s1378_s1 = inlined_call_operand.hbm [shape: f32[64,4], index: 1, kind: input, shape index: {}]   ;;  %s1379_s2 = inlined_call_operand.hbm [shape: f32[1,4], index: 2, kind: input, shape index: {}]   ;;  %s1380_s3 = inlined_call_operand.hbm [shape: f32[4,64], index: 3, kind: input, shape index: {}]   ;;  %s1381_s4 = inlined_call_operand.hbm [shape: f32[1,64], index: 4, kind: input, shape index: {}]   ;;  %s1382_s5 = inlined_call_operand.hbm [shape: f32[2,64,256], index: 5, kind: output, shape index: {}]  }
   0x1   :  { %11 = vsyncpa [#allocation6], 0 }
   0x2   :  { %12 = vsyncpa [#allocation9], 0 }
   0x3   :  { %13 = vsyncpa [#allocation4], 0  ;;  %s988_s18 = smov [#allocation5]   ;;  %s848_s22 = scalar_lea.hbm %s1378_s1, 1024 }
   0x4   :  { %s31_s19 = sshll.u32 %s988_s18, 4  ;;  %p849_p0 = scmp.ne.s32.totalorder %s1378_s1, %s848_s22  ;;  %s32_s19 = int_to_ptr.vmem [resolvable:$true] %s31_s19 }
   0x5   :  { %p852_p1 = scmp.lt.u32.totalorder %s848_s22, %s1378_s1 }
   0x7   :  { %p854_p2 = pnand %p852_p1, %p849_p0 }
   0x9   :  { %857 = shalt.err (!%p854_p2)
}
   0xa   :  { %s858_s27 = scalar_lea.vmem %s32_s19, 1024  ;;  %p863_p4 = scmp.lt.s32.totalorder %s32_s19, %s32_s19 }
   0xb   :  { %p859_p3 = scmp.ne.s32.totalorder %s32_s19, %s858_s27  ;;  %p864_p5 = scmp.lt.s32.totalorder %s858_s27, %s858_s27 }
   0xd   :  { %p865_p6 = por %p864_p5, %p863_p4 }
   0xf   :  { %p866_p7 = pnand %p865_p6, %p859_p3 }
  0x11   :  { %869 = shalt.err (!%p866_p7)
}
  0x12   :  { %s989_s28 = smov 128   ;;  %s990_s29 = smov 8  }
  0x13   :  { %37 = dma.hbm_to_vmem [thread:$0]  %s1378_s1, 1024, %s32_s19, [#allocation6], %s989_s28, %s989_s28, %s990_s29  }
  0x14   :  { %s991_s7 = smov [#allocation8]   ;;  %s992_s9 = smov [#allocation2]  }
  0x15   :  { %s54_s8 = sshll.u32 %s991_s7, 4  ;;  %s19_s10 = sshll.u32 %s992_s9, 4  ;;  %s55_s8 = int_to_ptr.vmem [resolvable:$true] %s54_s8  ;;  %s20_s10 = int_to_ptr.vmem [resolvable:$true] %s19_s10 }
  0x16   :  { %s870_s13 = scalar_lea.hbm %s1380_s3, 64 }
  0x17   :  { %p871_p8 = scmp.ne.s32.totalorder %s1380_s3, %s870_s13  ;;  %p874_p9 = scmp.lt.u32.totalorder %s870_s13, %s1380_s3 }
  0x19   :  { %p876_p10 = pnand %p874_p9, %p871_p8 }
  0x1b   :  { %879 = shalt.err (!%p876_p10)
}
  0x1c   :  { %s880_s1 = scalar_lea.vmem %s55_s8, 64  ;;  %p885_p12 = scmp.lt.s32.totalorder %s55_s8, %s55_s8 }
  0x1d   :  { %p881_p11 = scmp.ne.s32.totalorder %s55_s8, %s880_s1  ;;  %p886_p13 = scmp.lt.s32.totalorder %s880_s1, %s880_s1 }
  0x1f   :  { %p887_p0 = por %p886_p13, %p885_p12 }
  0x21   :  { %p888_p1 = pnand %p887_p0, %p881_p11 }
  0x23   :  { %891 = shalt.err (!%p888_p1)
}
  0x24   :  { %57 = dma.hbm_to_vmem [thread:$0]  %s1380_s3, 64, %s55_s8, [#allocation9]  }
  0x25   :  { %s892_s22 = scalar_lea.hbm %s1377_s0, 4096 }
  0x26   :  { %p893_p2 = scmp.ne.s32.totalorder %s1377_s0, %s892_s22  ;;  %p896_p3 = scmp.lt.u32.totalorder %s892_s22, %s1377_s0 }
  0x28   :  { %p898_p4 = pnand %p896_p3, %p893_p2 }
  0x2a   :  { %901 = shalt.err (!%p898_p4)
}
  0x2b   :  { %s902_s27 = scalar_lea.vmem %s20_s10, 4096  ;;  %p907_p6 = scmp.lt.s32.totalorder %s20_s10, %s20_s10 }
  0x2c   :  { %p903_p5 = scmp.ne.s32.totalorder %s20_s10, %s902_s27  ;;  %p908_p7 = scmp.lt.s32.totalorder %s902_s27, %s902_s27 }
  0x2e   :  { %p909_p8 = por %p908_p7, %p907_p6 }
  0x30   :  { %p910_p9 = pnand %p909_p8, %p903_p5 }
  0x32   :  { %913 = shalt.err (!%p910_p9)
}
  0x33   :  { %s993_s3 = smov 256   ;;  %s994_s28 = smov 16  }
  0x34   :  { %25 = dma.hbm_to_vmem [thread:$0]  %s1377_s0, 4096, %s20_s10, [#allocation3], %s993_s3, %s993_s3, %s994_s28  }
  0x35   :  { %s995_s6 = smov [#allocation7]   ;;  %s996_s8 = smov [#allocation10]  }
  0x36   :  { %s44_s7 = sshll.u32 %s995_s6, 4  ;;  %s64_s9 = sshll.u32 %s996_s8, 4  ;;  %s45_s7 = int_to_ptr.vmem [resolvable:$true] %s44_s7  ;;  %s65_s9 = int_to_ptr.vmem [resolvable:$true] %s64_s9 }
  0x37   :  { %s914_s13 = scalar_lea.hbm %s1379_s2, 16 }
  0x38   :  { %p915_p10 = scmp.ne.s32.totalorder %s1379_s2, %s914_s13  ;;  %p918_p11 = scmp.lt.u32.totalorder %s914_s13, %s1379_s2 }
  0x3a   :  { %p920_p12 = pnand %p918_p11, %p915_p10 }
  0x3c   :  { %923 = shalt.err (!%p920_p12)
}
  0x3d   :  { %s924_s0 = scalar_lea.vmem %s45_s7, 16  ;;  %s928_s10 = scalar_lea.vmem %s45_s7, 32 }
  0x3e   :  { %p925_p13 = scmp.ne.s32.totalorder %s45_s7, %s924_s0  ;;  %p929_p0 = scmp.lt.s32.totalorder %s45_s7, %s45_s7 }
  0x3f   :  { %p930_p1 = scmp.lt.s32.totalorder %s928_s10, %s924_s0 }
  0x41   :  { %p931_p2 = por %p930_p1, %p929_p0 }
  0x43   :  { %p932_p3 = pnand %p931_p2, %p925_p13 }
  0x45   :  { %935 = shalt.err (!%p932_p3)
}
  0x46   :  { %47 = dma.hbm_to_vmem [thread:$0]  %s1379_s2, 16, %s45_s7, [#allocation6]  }
  0x47   :  { %s936_s21 = scalar_lea.hbm %s1381_s4, 16 }
  0x48   :  { %p937_p4 = scmp.ne.s32.totalorder %s1381_s4, %s936_s21  ;;  %p940_p5 = scmp.lt.u32.totalorder %s936_s21, %s1381_s4 }
  0x4a   :  { %p942_p6 = pnand %p940_p5, %p937_p4 }
  0x4c   :  { %945 = shalt.err (!%p942_p6)
}
  0x4d   :  { %s946_s26 = scalar_lea.vmem %s65_s9, 16  ;;  %s950_s27 = scalar_lea.vmem %s65_s9, 32 }
  0x4e   :  { %p947_p7 = scmp.ne.s32.totalorder %s65_s9, %s946_s26  ;;  %p951_p8 = scmp.lt.s32.totalorder %s65_s9, %s65_s9 }
  0x4f   :  { %p952_p9 = scmp.lt.s32.totalorder %s950_s27, %s946_s26 }
  0x51   :  { %p953_p10 = por %p952_p9, %p951_p8 }
  0x53   :  { %p954_p11 = pnand %p953_p10, %p947_p7 }
  0x55   :  { %957 = shalt.err (!%p954_p11)
}
  0x56   :  { %67 = dma.hbm_to_vmem [thread:$0]  %s1381_s4, 16, %s65_s9, [#allocation9]  }
  0x57   :  { %980 = dma.done.wait [#allocation3], 4096  }
  0x58   :  { %981 = vsyncadd [#allocation3], 4294963200 }
  0x59   :  { %982 = dma.done.wait [#allocation6], 1040  }
  0x5a   :  { %983 = vsyncadd [#allocation6], 4294966256 }
  0x5b   :  { %984 = dma.done.wait [#allocation9], 80  }
  0x5c   :  { %985 = vsyncadd [#allocation9], 4294967216  ;;  %v1094_v0 = vld [vmem:[#allocation2 + $0x80] sm:$0xff]  ;;  %v1096_v1 = vld [vmem:[#allocation2 + $0x88] sm:$0xff]  ;;  %vm998_vm0 = vmmov 0   ;;  %vm254_vm1 = vcmask 130112  }
  0x5d   :  { %v1098_v2 = vld [vmem:[#allocation2] sm:$0xff]  ;;  %v187_v3 = vadd.f32 %v1096_v1, %v1094_v0  ;;  %v1102_v4 = vld [vmem:[#allocation2 + $0x8] sm:$0xff]  ;;  %v1104_v5 = vld [vmem:[#allocation2 + $0x90] sm:$0xff]  ;;  %v139_v21 = vmax.f32 %v1094_v0, %v1096_v1  ;;  %vm261_vm2 = vcmask 195712   ;;  %vm268_vm3 = vcmask 261312   ;;  %s1000_s4 = smov [#allocation11]  }
  0x5e   :  { %1395 = vst [vmem:[#allocation16_spill] sm:$0xff] %v1104_v5  ;;  %v1106_v6 = vld [vmem:[#allocation2 + $0x98] sm:$0xff]  ;;  %v163_v7 = vadd.f32 %v1102_v4, %v1098_v2  ;;  %v1110_v8 = vld [vmem:[#allocation2 + $0x10] sm:$0xff]  ;;  %v1118_v12 = vld [vmem:[#allocation2 + $0xa0] sm:$0xff]  ;;  %v115_v19 = vmax.f32 %v1098_v2, %v1102_v4  ;;  %vm275_vm4 = vcmask 326912   ;;  %vm282_vm5 = vcmask 392512  }
  0x5f   :  { %1396 = vst [vmem:[#allocation17_spill] sm:$0xff] %v1106_v6  ;;  %v1112_v9 = vld [vmem:[#allocation2 + $0x18] sm:$0xff]  ;;  %188 = vadd.xlane.f32.xlu1 %v187_v3  ;;  %v190_v10 = vadd.f32 %v1106_v6, %v1104_v5  ;;  %v1120_v13 = vld [vmem:[#allocation2 + $0xa8] sm:$0xff]  ;;  %v1122_v14 = vld [vmem:[#allocation2 + $0x20] sm:$0xff]  ;;  %v142_v20 = vmax.f32 %v1104_v5, %v1106_v6  ;;  %vm289_vm6 = vcmask 458112   ;;  %vm296_vm7 = vcmask 523712  }
  0x60   :  { %164 = vadd.xlane.f32.xlu0 %v163_v7  ;;  %v166_v11 = vadd.f32 %v1112_v9, %v1110_v8  ;;  %v1124_v15 = vld [vmem:[#allocation2 + $0x28] sm:$0xff]  ;;  %v193_v16 = vadd.f32 %v1120_v13, %v1118_v12  ;;  %v118_v18 = vmax.f32 %v1110_v8, %v1112_v9  ;;  %v1138_v22 = vld [vmem:[#allocation2 + $0xb0] sm:$0xff]  ;;  %v1140_v23 = vld [vmem:[#allocation2 + $0xb8] sm:$0xff]  ;;  %v145_v28 = vmax.f32 %v1118_v12, %v1120_v13  ;;  %s764_s30 = sshll.u32 %s1000_s4, 4  ;;  %s765_s30 = int_to_ptr.vmem [resolvable:$true] %s764_s30 }
  0x61   :  { %v169_v17 = vadd.f32 %v1124_v15, %v1122_v14  ;;  %1397 = vst [vmem:[#allocation18_spill] sm:$0xff] %v1138_v22  ;;  %1398 = vst [vmem:[#allocation19_spill] sm:$0xff] %v1140_v23  ;;  %v1142_v24 = vld [vmem:[#allocation2 + $0x30] sm:$0xff]  ;;  %v1144_v25 = vld [vmem:[#allocation2 + $0x38] sm:$0xff]  ;;  %v196_v26 = vadd.f32 %v1140_v23, %v1138_v22  ;;  %v121_v29 = vmax.f32 %v1122_v14, %v1124_v15  ;;  %vm337_vm8 = vcmask 1041409   ;;  %s958_s6 = scalar_lea.vmem %s765_s30, 4096  ;;  %p963_p13 = scmp.lt.s32.totalorder %s765_s30, %s765_s30 }
  0x62   :  { %v172_v27 = vadd.f32 %v1144_v25, %v1142_v24  ;;  %v1154_v30 = vld [vmem:[#allocation2 + $0xc0] sm:$0xff]  ;;  %v1156_v31 = vld [vmem:[#allocation2 + $0xc8] sm:$0xff]  ;;  %v148_v36 = vmax.f32 %v1138_v22, %v1140_v23  ;;  %v124_v37 = vmax.f32 %v1142_v24, %v1144_v25  ;;  %v1170_v38 = vld [vmem:[#allocation2 + $0xd0] sm:$0xff]  ;;  %vm434_vm9 = vcmask 1043459   ;;  %p959_p12 = scmp.ne.s32.totalorder %s765_s30, %s958_s6  ;;  %p964_p0 = scmp.lt.s32.totalorder %s958_s6, %s958_s6 }
  0x63   :  { %191 = vadd.xlane.f32.xlu1 %v190_v10  ;;  %1399 = vst [vmem:[#allocation20_spill] sm:$0xff] %v1154_v30  ;;  %1400 = vst [vmem:[#allocation21_spill] sm:$0xff] %v1156_v31  ;;  %v1158_v32 = vld [vmem:[#allocation2 + $0x40] sm:$0xff]  ;;  %v1160_v33 = vld [vmem:[#allocation2 + $0x48] sm:$0xff]  ;;  %v199_v34 = vadd.f32 %v1156_v31, %v1154_v30  ;;  %v151_v44 = vmax.f32 %v1154_v30, %v1156_v31  ;;  %vm437_vm10 = vcmask 1041408   ;;  %vm454_vm11 = vcmask 523264  }
  0x64   :  { %167 = vadd.xlane.f32.xlu0 %v166_v11  ;;  %v175_v35 = vadd.f32 %v1160_v33, %v1158_v32  ;;  %1401 = vst [vmem:[#allocation22_spill] sm:$0xff] %v1170_v38  ;;  %v1172_v39 = vld [vmem:[#allocation2 + $0xd8] sm:$0xff]  ;;  %v1174_v40 = vld [vmem:[#allocation2 + $0x50] sm:$0xff]  ;;  %v127_v45 = vmax.f32 %v1158_v32, %v1160_v33  ;;  %v1186_v46 = vld [vmem:[#allocation2 + $0xe0] sm:$0xff]  ;;  %v997_v11 = vmov 0.0|0.0   ;;  %vm541_vm12 = vcmask 1043456   ;;  %p965_p1 = por %p964_p0, %p963_p13 }
  0x65   :  { %1402 = vst [vmem:[#allocation23_spill] sm:$0xff] %v1172_v39  ;;  %v1176_v41 = vld [vmem:[#allocation2 + $0x58] sm:$0xff]  ;;  %v202_v42 = vadd.f32 %v1172_v39, %v1170_v38  ;;  %1403 = vst [vmem:[#allocation24_spill] sm:$0xff] %v1186_v46  ;;  %v1188_v47 = vld [vmem:[#allocation2 + $0xe8] sm:$0xff]  ;;  %v154_v52 = vmax.f32 %v1170_v38, %v1172_v39  ;;  %819 = vmatprep.subr.bf16.mxu0 %v997_v11  ;;  %vm537_vm13 = vcmask 31744  }
  0x66   :  { %v178_v43 = vadd.f32 %v1176_v41, %v1174_v40  ;;  %1404 = vst [vmem:[#allocation25_spill] sm:$0xff] %v1188_v47  ;;  %v1190_v48 = vld [vmem:[#allocation2 + $0x60] sm:$0xff]  ;;  %v1192_v49 = vld [vmem:[#allocation2 + $0x68] sm:$0xff]  ;;  %v205_v50 = vadd.f32 %v1188_v47, %v1186_v46  ;;  %v130_v53 = vmax.f32 %v1174_v40, %v1176_v41  ;;  %v1202_v54 = vld [vmem:[#allocation2 + $0xf0] sm:$0xff]  ;;  %v157_v60 = vmax.f32 %v1186_v46, %v1188_v47  ;;  %p966_p2 = pnand %p965_p1, %p959_p12 }
  0x67   :  { %194 = vadd.xlane.f32.xlu1 %v193_v16  ;;  %v181_v51 = vadd.f32 %v1192_v49, %v1190_v48  ;;  %1405 = vst [vmem:[#allocation26_spill] sm:$0xff] %v1202_v54  ;;  %v1204_v55 = vld [vmem:[#allocation2 + $0xf8] sm:$0xff]  ;;  %v1206_v56 = vld [vmem:[#allocation2 + $0x70] sm:$0xff]  ;;  %v133_v61 = vmax.f32 %v1190_v48, %v1192_v49  ;;  %v439_v3 = vld [vmem:[#allocation5] sm:$0xff] }
  0x68   :  { %170 = vadd.xlane.f32.xlu0 %v169_v17  ;;  %1406 = vst [vmem:[#allocation27_spill] sm:$0xff] %v1204_v55  ;;  %v1208_v57 = vld [vmem:[#allocation2 + $0x78] sm:$0xff]  ;;  %v208_v58 = vadd.f32 %v1204_v55, %v1202_v54  ;;  %v160_v62 = vmax.f32 %v1202_v54, %v1204_v55  ;;  %v440_v7 = vld [vmem:[#allocation5 + $0x8] sm:$0xff]  ;;  %v441_v16 = vld [vmem:[#allocation5 + $0x10] sm:$0xff] }
  0x69   :  { %v184_v59 = vadd.f32 %v1208_v57, %v1206_v56  ;;  %v136_v63 = vmax.f32 %v1206_v56, %v1208_v57  ;;  %v820_v10 = vpack.c.bf16 %v440_v7, %v439_v3  ;;  %v442_v17 = vld [vmem:[#allocation5 + $0x18] sm:$0xff] }
  0x6b   :  { %119 = vmax.xlane.f32.xlu1 %v118_v18  ;;  %821 = vmatpush3.bf16.msra.mxu0 %v820_v10  ;;  %v823_v18 = vpack.c.bf16 %v442_v17, %v441_v16 }
  0x6c   :  { %116 = vmax.xlane.f32.xlu0 %v115_v19  ;;  %822 = vmatprep.subr.bf16.mxu0 %v997_v11  ;;  %v443_v19 = vld [vmem:[#allocation5 + $0x20] sm:$0xff] }
  0x6f   :  { %143 = vmax.xlane.f32.xlu1 %v142_v20  ;;  %824 = vmatpush3.bf16.msra.mxu0 %v823_v18  ;;  %v444_v20 = vld [vmem:[#allocation5 + $0x28] sm:$0xff] }
  0x70   :  { %140 = vmax.xlane.f32.xlu0 %v139_v21  ;;  %825 = vmatprep.subr.bf16.mxu0 %v997_v11  ;;  %v826_v21 = vpack.c.bf16 %v444_v20, %v443_v19 }
  0x73   :  { %197 = vadd.xlane.f32.xlu1 %v196_v26  ;;  %827 = vmatpush3.bf16.msra.mxu0 %v826_v21  ;;  %v445_v26 = vld [vmem:[#allocation5 + $0x30] sm:$0xff] }
  0x74   :  { %173 = vadd.xlane.f32.xlu0 %v172_v27  ;;  %828 = vmatprep.subr.bf16.mxu0 %v997_v11  ;;  %v446_v27 = vld [vmem:[#allocation5 + $0x38] sm:$0xff] }
  0x77   :  { %146 = vmax.xlane.f32.xlu1 %v145_v28  ;;  %v829_v28 = vpack.c.bf16 %v446_v27, %v445_v26 }
  0x78   :  { %122 = vmax.xlane.f32.xlu0 %v121_v29  ;;  %v999_v29 = vmov 0.0  }
  0x79   :  { %830 = vmatpush3.bf16.msra.mxu0 %v829_v28  ;;  %811 = vmatprep.mubr.msk.f32.mxu0 %vm998_vm0, %v999_v29 }
  0x7a   :  { %814 = vmatprep.subr.mxu1 %v999_v29  ;;  %816 = vmatprep.mubr.msk.f32.mxu1 %vm998_vm0, %v999_v29 }
  0x7b   :  { %200 = vadd.xlane.f32.xlu1 %v199_v34 }
  0x7c   :  { %176 = vadd.xlane.f32.xlu0 %v175_v35 }
  0x7f   :  { %149 = vmax.xlane.f32.xlu1 %v148_v36 }
  0x80   :  { %125 = vmax.xlane.f32.xlu0 %v124_v37 }
  0x83   :  { %203 = vadd.xlane.f32.xlu1 %v202_v42 }
  0x84   :  { %179 = vadd.xlane.f32.xlu0 %v178_v43 }
  0x87   :  { %152 = vmax.xlane.f32.xlu1 %v151_v44 }
  0x88   :  { %128 = vmax.xlane.f32.xlu0 %v127_v45 }
  0x8b   :  { %206 = vadd.xlane.f32.xlu1 %v205_v50 }
  0x8c   :  { %182 = vadd.xlane.f32.xlu0 %v181_v51 }
  0x8f   :  { %155 = vmax.xlane.f32.xlu1 %v154_v52 }
  0x90   :  { %131 = vmax.xlane.f32.xlu0 %v130_v53 }
  0x93   :  { %209 = vadd.xlane.f32.xlu1 %v208_v58 }
  0x94   :  { %185 = vadd.xlane.f32.xlu0 %v184_v59 }
  0x97   :  { %158 = vmax.xlane.f32.xlu1 %v157_v60 }
  0x98   :  { %134 = vmax.xlane.f32.xlu0 %v133_v61 }
  0x9b   :  { %161 = vmax.xlane.f32.xlu1 %v160_v62  ;;  %v243_v62 = vlaneseq }
  0x9c   :  { %137 = vmax.xlane.f32.xlu0 %v136_v63 }
  0x9d   :  { %v244_v7 = vand.u32 127, %v243_v62  ;;  %v1238_v11 = vshrl.u32 %v243_v62, 7 }
  0x9f   :  { %v249_v16 = vadd.s32 4294967288, %v244_v7  ;;  %v256_v17 = vadd.s32 4294967280, %v244_v7  ;;  %v263_v19 = vadd.s32 4294967272, %v244_v7  ;;  %v247_v21 = vsub.s32 %v244_v7, %v1238_v11 }
  0xa0   :  { %v270_v28 = vadd.s32 4294967264, %v244_v7  ;;  %v277_v62 = vadd.s32 4294967256, %v244_v7  ;;  %v284_v39 = vadd.s32 4294967248, %v244_v7 }
  0xa1   :  { %v252_v26 = vsub.s32 %v249_v16, %v1238_v11  ;;  %v1245_v27 = vsub.s32 %v256_v17, %v1238_v11  ;;  %v1250_v22 = vsub.s32 %v263_v19, %v1238_v11 }
  0xa2   :  { %v1253_v30 = vsub.s32 %v270_v28, %v1238_v11 }
  0xec   :  { %v189_v34 = vpop.xlane.xlu1 %188 }
  0xed   :  { %v165_v35 = vpop.xlane.xlu0 %164  ;;  %v219_v38 = vmul.f32 0.00390625, %v189_v34  ;;  %v1256_v34 = vsub.s32 %v277_v62, %v1238_v11 }
  0xee   :  { %v211_v47 = vmul.f32 0.00390625, %v165_v35  ;;  %v1259_v35 = vsub.s32 %v284_v39, %v1238_v11 }
  0xf0   :  { %v192_v36 = vpop.xlane.xlu1 %191 }
  0xf1   :  { %v168_v37 = vpop.xlane.xlu0 %167  ;;  %v220_v55 = vmul.f32 0.00390625, %v192_v36 }
  0xf2   :  { %v212_v54 = vmul.f32 0.00390625, %v168_v37  ;;  %v291_v37 = vadd.s32 4294967240, %v244_v7 }
  0xf3   :  { %v402_v6 = vrot.slane %v220_v55, %v252_v26 }
  0xf4   :  { %v195_v42 = vpop.xlane.xlu1 %194  ;;  %v363_v5 = vrot.slane %v212_v54, %v252_v26 }
  0xf5   :  { %v171_v43 = vpop.xlane.xlu0 %170  ;;  %v221_v46 = vmul.f32 0.00390625, %v195_v42  ;;  %v398_v42 = vrot.slane %v219_v38, %v247_v21 }
  0xf6   :  { %v213_v23 = vmul.f32 0.00390625, %v171_v43  ;;  %v359_v43 = vrot.slane %v211_v47, %v247_v21 }
  0xf7   :  { %v407_v19 = vrot.slane %v221_v46, %v1245_v27  ;;  %v1270_v46 = vsub.s32 %v291_v37, %v1238_v11 }
  0xf8   :  { %v1222_v44 = vpop.xlane.xlu1 %119 }
  0xf9   :  { %v1224_v45 = vpop.xlane.xlu0 %116 }
  0xfa   :  { %v248_v28 = vrot.slane %v1224_v45, %v247_v21 }
  0xfc   :  { %v1226_v50 = vpop.xlane.xlu1 %143 }
  0xfd   :  { %v1228_v51 = vpop.xlane.xlu0 %140  ;;  %v305_v55 = vrot.slane %v1226_v50, %v252_v26 }
  0xfe   :  { %v301_v54 = vrot.slane %v1228_v51, %v247_v21 }
 0x100   :  { %v198_v52 = vpop.xlane.xlu1 %197 }
 0x101   :  { %v174_v53 = vpop.xlane.xlu0 %173  ;;  %v222_v17 = vmul.f32 0.00390625, %v198_v52  ;;  %v368_v52 = vrot.slane %v213_v23, %v1245_v27  ;;  %v403_v23 = vsel %vm254_vm1, %v402_v6, %v398_v42 }
 0x102   :  { %v214_v31 = vmul.f32 0.00390625, %v174_v53  ;;  %v253_v53 = vrot.slane %v1222_v44, %v252_v26  ;;  %v364_v44 = vsel %vm254_vm1, %v363_v5, %v359_v43  ;;  %v408_v51 = vsel %vm261_vm2, %v407_v19, %v403_v23 }
 0x103   :  { %v412_v62 = vrot.slane %v222_v17, %v1250_v22  ;;  %v369_v21 = vsel %vm261_vm2, %v368_v52, %v364_v44  ;;  %v306_v17 = vsel %vm254_vm1, %v305_v55, %v301_v54 }
 0x104   :  { %v1230_v58 = vpop.xlane.xlu1 %146  ;;  %v373_v39 = vrot.slane %v214_v31, %v1250_v22  ;;  %v255_v26 = vsel %vm254_vm1, %v253_v53, %v248_v28 }
 0x105   :  { %v1232_v59 = vpop.xlane.xlu0 %122  ;;  %v310_v45 = vrot.slane %v1230_v58, %v1245_v27  ;;  %v413_v42 = vsel %vm268_vm3, %v412_v62, %v408_v51 }
 0x106   :  { %v260_v31 = vrot.slane %v1232_v59, %v1245_v27  ;;  %v374_v58 = vsel %vm268_vm3, %v373_v39, %v369_v21 }
 0x107   :  { %v311_v52 = vsel %vm261_vm2, %v310_v45, %v306_v17 }
 0x108   :  { %v201_v60 = vpop.xlane.xlu1 %200 }
 0x109   :  { %v177_v61 = vpop.xlane.xlu0 %176  ;;  %v223_v38 = vmul.f32 0.00390625, %v201_v60 }
 0x10a   :  { %v215_v50 = vmul.f32 0.00390625, %v177_v61 }
 0x10b   :  { %v417_v61 = vrot.slane %v223_v38, %v1253_v30 }
 0x10c   :  { %v1234_v63 = vpop.xlane.xlu1 %149  ;;  %v378_v59 = vrot.slane %v215_v50, %v1253_v30 }
 0x10d   :  { %v1236_v3 = vpop.xlane.xlu0 %125  ;;  %v418_v38 = vsel %vm275_vm4, %v417_v61, %v413_v42 }
 0x10e   :  { %v267_v53 = vrot.slane %v1236_v3, %v1250_v22  ;;  %v379_v44 = vsel %vm275_vm4, %v378_v59, %v374_v58 }
 0x110   :  { %v204_v10 = vpop.xlane.xlu1 %203 }
 0x111   :  { %v180_v18 = vpop.xlane.xlu0 %179  ;;  %v224_v60 = vmul.f32 0.00390625, %v204_v10 }
 0x112   :  { %v216_v6 = vmul.f32 0.00390625, %v180_v18  ;;  %v262_v18 = vsel %vm261_vm2, %v260_v31, %v255_v26 }
 0x113   :  { %v422_v28 = vrot.slane %v224_v60, %v1256_v34  ;;  %v269_v50 = vsel %vm268_vm3, %v267_v53, %v262_v18  ;;  %v529_v18 = vld [vmem:[#allocation8] sm:$0xf] }
 0x114   :  { %v1240_v20 = vpop.xlane.xlu1 %152  ;;  %815 = vmatpush3.msk.msra.mxu1 %vm541_vm12, %v529_v18  ;;  %v1412_v18 = vld [vmem:[#allocation19_spill] sm:$0xff] }
 0x115   :  { %v1247_v29 = vpop.xlane.xlu0 %128  ;;  %v320_v55 = vrot.slane %v1240_v20, %v1253_v30  ;;  %v423_v51 = vsel %vm282_vm5, %v422_v28, %v418_v38 }
 0x116   :  { %v274_v54 = vrot.slane %v1247_v29, %v1253_v30 }
 0x118   :  { %v207_v16 = vpop.xlane.xlu1 %206 }
 0x119   :  { %v183_v36 = vpop.xlane.xlu0 %182  ;;  %v225_v37 = vmul.f32 0.00390625, %v207_v16  ;;  %v315_v16 = vrot.slane %v1234_v63, %v1250_v22 }
 0x11a   :  { %v217_v43 = vmul.f32 0.00390625, %v183_v36  ;;  %v383_v36 = vrot.slane %v216_v6, %v1256_v34 }
 0x11b   :  { %v427_v62 = vrot.slane %v225_v37, %v1259_v35  ;;  %v316_v29 = vsel %vm268_vm3, %v315_v16, %v311_v52  ;;  %v778_v16 = vld [vmem:[#allocation7] ss:$0 sm:$0xff] }
 0x11c   :  { %v156_v7 = vpop.xlane.xlu1 %155  ;;  %v388_v63 = vrot.slane %v217_v43, %v1259_v35 }
 0x11d   :  { %v132_v47 = vpop.xlane.xlu0 %131  ;;  %v325_v23 = vrot.slane %v156_v7, %v1256_v34  ;;  %v384_v7 = vsel %vm282_vm5, %v383_v36, %v379_v44  ;;  %v428_v31 = vsel %vm289_vm6, %v427_v62, %v423_v51  ;;  %v627_v44 = vsub.s32 0, %v1238_v11 }
 0x11e   :  { %v281_v22 = vrot.slane %v132_v47, %v1256_v34  ;;  %v321_v34 = vsel %vm275_vm4, %v320_v55, %v316_v29  ;;  %v276_v47 = vsel %vm275_vm4, %v274_v54, %v269_v50  ;;  %v389_v26 = vsel %vm289_vm6, %v388_v63, %v384_v7  ;;  %v780_v55 = vld [vmem:[#allocation10] ss:$0 sm:$0xff] }
 0x11f   :  { %v326_v17 = vsel %vm282_vm5, %v325_v23, %v321_v34 }
 0x120   :  { %v210_v5 = vpop.xlane.xlu1 %209  ;;  %v283_v6 = vsel %vm282_vm5, %v281_v22, %v276_v47 }
 0x121   :  { %v186_v19 = vpop.xlane.xlu0 %185  ;;  %v226_v10 = vmul.f32 0.00390625, %v210_v5 }
 0x122   :  { %v218_v27 = vmul.f32 0.00390625, %v186_v19 }
 0x123   :  { %v432_v45 = vrot.slane %v226_v10, %v1270_v46 }
 0x124   :  { %v159_v39 = vpop.xlane.xlu1 %158  ;;  %v393_v20 = vrot.slane %v218_v27, %v1270_v46 }
 0x125   :  { %v135_v3 = vpop.xlane.xlu0 %134  ;;  %v330_v30 = vrot.slane %v159_v39, %v1259_v35 }
 0x126   :  { %v288_v21 = vrot.slane %v135_v3, %v1259_v35  ;;  %v433_v35 = vsel %vm296_vm7, %v432_v45, %v428_v31  ;;  %v394_v42 = vsel %vm296_vm7, %v393_v20, %v389_v26 }
 0x127   :  { %v331_v58 = vsel %vm289_vm6, %v330_v30, %v326_v17  ;;  %v435_v10 = vsel %vm434_vm9, %v433_v35, %v394_v42  ;;  %v662_v30 = vsub.s32 1, %v1238_v11 }
 0x128   :  { %v162_v60 = vpop.xlane.xlu1 %161  ;;  %v290_v43 = vsel %vm289_vm6, %v288_v21, %v283_v6 }
 0x129   :  { %v335_v37 = vrot.slane %v162_v60, %v1270_v46  ;;  %v138_v5 = vpop.xlane.xlu0 %137 }
 0x12a   :  { %v295_v61 = vrot.slane %v138_v5, %v1270_v46 }
 0x12b   :  { %v336_v19 = vsel %vm296_vm7, %v335_v37, %v331_v58 }
 0x12c   :  { %v297_v52 = vsel %vm296_vm7, %v295_v61, %v290_v43  ;;  %v1408_v43 = vld [vmem:[#allocation17_spill] sm:$0xff] }
 0x12d   :  { %v338_v59 = vsel %vm337_vm8, %v336_v19, %v297_v52  ;;  %v1409_v52 = vld [vmem:[#allocation20_spill] sm:$0xff] }
 0x12e   :  { %v438_v27 = vsel %vm437_vm10, %v338_v59, %v435_v10  ;;  %v1410_v10 = vld [vmem:[#allocation21_spill] sm:$0xff] }
 0x12f   :  { %812 = vmatmul.mubr.msk.f32.vlgmr.msra.gmra.mrb[0].mxu0 %vm454_vm11, %v438_v27 }
 0x202   :  { %v524_v53 = vpop.f32.mrb[0].mxu0 }
 0x203   :  { %v525_v46 = vadd.f32 %v778_v16, %v524_v53  ;;  %v813_v28 = vpop.f32.mrb[1].mxu0  ;;  %v1413_v53 = vld [vmem:[#allocation24_spill] sm:$0xff] }
 0x204   :  { %v1414_v28 = vld [vmem:[#allocation25_spill] sm:$0xff] }
 0x205   :  { %v528_v36 = vmax.f32 %v525_v46, 0.0 }
 0x207   :  { %817 = vmatmul.mubr.msk.f32.vlgmr.msra.gmra.mrb[0].mxu1 %vm537_vm13, %v528_v36 }
 0x2da   :  { %v611_v54 = vpop.f32.mrb[0].mxu1 }
 0x2db   :  { %v612_v62 = vadd.f32 %v780_v55, %v611_v54  ;;  %v818_v39 = vpop.f32.mrb[1].mxu1  ;;  %v1415_v54 = vld [vmem:[#allocation22_spill] sm:$0xff] }
 0x2dc   :  { %v1416_v39 = vld [vmem:[#allocation23_spill] sm:$0xff] }
 0x2dd   :  { %v616_v38 = vrot.slane %v612_v62, 2 }
 0x2df   :  { %v618_v63 = vadd.f32 %v616_v38, %v612_v62 }
 0x2e1   :  { %v783_v23 = vmul.f32 -1.442695, %v618_v63 }
 0x2e3   :  { %844 = vpow2.f32 %v783_v23  ;;  %v1417_v23 = vld [vmem:[#allocation26_spill] sm:$0xff] }
 0x2ed   :  { %v845_v22 = vpop.eup %844 }
 0x2ee   :  { %v622_v3 = vadd.f32 1.0, %v845_v22 }
 0x2f0   :  { %846 = vrcp.f32 %v622_v3  ;;  %v1418_v3 = vld [vmem:[#allocation27_spill] sm:$0xff] }
 0x2fa   :  { %v847_v45 = vpop.eup %846 }
 0x2fb   :  { %v628_v20 = vrot.slane %v847_v45, %v627_v44  ;;  %v663_v29 = vrot.slane %v847_v45, %v662_v30 }
 0x2fd   :  { %634 = vbcast.lane.b32.xlu1 %v628_v20, 264  ;;  %630 = vbcast.lane.b32.xlu0 %v628_v20, 256 }
 0x301   :  { %638 = vbcast.lane.b32.xlu1 %v628_v20, 272  ;;  %646 = vbcast.lane.b32.xlu0 %v628_v20, 288 }
 0x305   :  { %642 = vbcast.lane.b32.xlu1 %v628_v20, 280  ;;  %654 = vbcast.lane.b32.xlu0 %v628_v20, 304 }
 0x309   :  { %650 = vbcast.lane.b32.xlu1 %v628_v20, 296  ;;  %665 = vbcast.lane.b32.xlu0 %v663_v29, 256 }
 0x30d   :  { %658 = vbcast.lane.b32.xlu1 %v628_v20, 312  ;;  %673 = vbcast.lane.b32.xlu0 %v663_v29, 272 }
 0x311   :  { %669 = vbcast.lane.b32.xlu1 %v663_v29, 264  ;;  %681 = vbcast.lane.b32.xlu0 %v663_v29, 288 }
 0x315   :  { %677 = vbcast.lane.b32.xlu1 %v663_v29, 280  ;;  %689 = vbcast.lane.b32.xlu0 %v663_v29, 304 }
 0x319   :  { %685 = vbcast.lane.b32.xlu1 %v663_v29, 296 }
 0x31d   :  { %693 = vbcast.lane.b32.xlu1 %v663_v29, 312 }
 0x36f   :  { %v635_v50 = vpop.permute.xlu1 %634  ;;  %v631_v51 = vpop.permute.xlu0 %630 }
 0x370   :  { %v697_v21 = vmul.f32 %v635_v50, %v1110_v8  ;;  %v698_v7 = vmul.f32 %v635_v50, %v1112_v9  ;;  %v695_v11 = vmul.f32 %v631_v51, %v1098_v2  ;;  %v696_v34 = vmul.f32 %v631_v51, %v1102_v4 }
 0x372   :  { %729 = vst [vmem:[#allocation11 + $0x10] sm:$0xff] %v697_v21  ;;  %730 = vst [vmem:[#allocation11 + $0x18] sm:$0xff] %v698_v7 }
 0x373   :  { %727 = vst [vmem:[#allocation11] sm:$0xff] %v695_v11  ;;  %728 = vst [vmem:[#allocation11 + $0x8] sm:$0xff] %v696_v34  ;;  %v639_v47 = vpop.permute.xlu1 %638  ;;  %v647_v31 = vpop.permute.xlu0 %646 }
 0x374   :  { %v699_v60 = vmul.f32 %v639_v47, %v1122_v14  ;;  %v700_v26 = vmul.f32 %v639_v47, %v1124_v15  ;;  %v703_v17 = vmul.f32 %v647_v31, %v1158_v32  ;;  %v704_v8 = vmul.f32 %v647_v31, %v1160_v33 }
 0x376   :  { %731 = vst [vmem:[#allocation11 + $0x20] sm:$0xff] %v699_v60  ;;  %732 = vst [vmem:[#allocation11 + $0x28] sm:$0xff] %v700_v26 }
 0x377   :  { %735 = vst [vmem:[#allocation11 + $0x40] sm:$0xff] %v703_v17  ;;  %736 = vst [vmem:[#allocation11 + $0x48] sm:$0xff] %v704_v8  ;;  %v643_v2 = vpop.permute.xlu1 %642  ;;  %v655_v4 = vpop.permute.xlu0 %654 }
 0x378   :  { %v701_v9 = vmul.f32 %v643_v2, %v1142_v24  ;;  %v702_v6 = vmul.f32 %v643_v2, %v1144_v25  ;;  %v707_v37 = vmul.f32 %v655_v4, %v1190_v48  ;;  %v708_v14 = vmul.f32 %v655_v4, %v1192_v49 }
 0x37a   :  { %733 = vst [vmem:[#allocation11 + $0x30] sm:$0xff] %v701_v9  ;;  %734 = vst [vmem:[#allocation11 + $0x38] sm:$0xff] %v702_v6 }
 0x37b   :  { %739 = vst [vmem:[#allocation11 + $0x60] sm:$0xff] %v707_v37  ;;  %740 = vst [vmem:[#allocation11 + $0x68] sm:$0xff] %v708_v14  ;;  %v651_v15 = vpop.permute.xlu1 %650  ;;  %v666_v32 = vpop.permute.xlu0 %665 }
 0x37c   :  { %v705_v33 = vmul.f32 %v651_v15, %v1174_v40  ;;  %v706_v5 = vmul.f32 %v651_v15, %v1176_v41  ;;  %v711_v35 = vmul.f32 %v666_v32, %v1094_v0  ;;  %v712_v24 = vmul.f32 %v666_v32, %v1096_v1  ;;  %v1407_v41 = vld [vmem:[#allocation16_spill] sm:$0xff] }
 0x37e   :  { %737 = vst [vmem:[#allocation11 + $0x50] sm:$0xff] %v705_v33  ;;  %738 = vst [vmem:[#allocation11 + $0x58] sm:$0xff] %v706_v5 }
 0x37f   :  { %743 = vst [vmem:[#allocation11 + $0x80] sm:$0xff] %v711_v35  ;;  %744 = vst [vmem:[#allocation11 + $0x88] sm:$0xff] %v712_v24  ;;  %v659_v25 = vpop.permute.xlu1 %658  ;;  %v674_v48 = vpop.permute.xlu0 %673 }
 0x380   :  { %v709_v49 = vmul.f32 %v659_v25, %v1206_v56  ;;  %v710_v42 = vmul.f32 %v659_v25, %v1208_v57  ;;  %v715_v58 = vmul.f32 %v674_v48, %v1118_v12  ;;  %v716_v40 = vmul.f32 %v674_v48, %v1120_v13  ;;  %v1411_v57 = vld [vmem:[#allocation18_spill] sm:$0xff] }
 0x382   :  { %741 = vst [vmem:[#allocation11 + $0x70] sm:$0xff] %v709_v49  ;;  %742 = vst [vmem:[#allocation11 + $0x78] sm:$0xff] %v710_v42 }
 0x383   :  { %747 = vst [vmem:[#allocation11 + $0xa0] sm:$0xff] %v715_v58  ;;  %748 = vst [vmem:[#allocation11 + $0xa8] sm:$0xff] %v716_v40  ;;  %v670_v0 = vpop.permute.xlu1 %669  ;;  %v682_v1 = vpop.permute.xlu0 %681 }
 0x384   :  { %v713_v61 = vmul.f32 %v670_v0, %v1407_v41  ;;  %v714_v19 = vmul.f32 %v670_v0, %v1408_v43  ;;  %v719_v59 = vmul.f32 %v682_v1, %v1409_v52  ;;  %v720_v56 = vmul.f32 %v682_v1, %v1410_v10 }
 0x386   :  { %745 = vst [vmem:[#allocation11 + $0x90] sm:$0xff] %v713_v61  ;;  %746 = vst [vmem:[#allocation11 + $0x98] sm:$0xff] %v714_v19 }
 0x387   :  { %751 = vst [vmem:[#allocation11 + $0xc0] sm:$0xff] %v719_v59  ;;  %752 = vst [vmem:[#allocation11 + $0xc8] sm:$0xff] %v720_v56  ;;  %v678_v12 = vpop.permute.xlu1 %677  ;;  %v690_v13 = vpop.permute.xlu0 %689 }
 0x388   :  { %v717_v27 = vmul.f32 %v678_v12, %v1411_v57  ;;  %v718_v16 = vmul.f32 %v678_v12, %v1412_v18  ;;  %v723_v46 = vmul.f32 %v690_v13, %v1413_v53  ;;  %v724_v36 = vmul.f32 %v690_v13, %v1414_v28 }
 0x38a   :  { %749 = vst [vmem:[#allocation11 + $0xb0] sm:$0xff] %v717_v27  ;;  %750 = vst [vmem:[#allocation11 + $0xb8] sm:$0xff] %v718_v16 }
 0x38b   :  { %755 = vst [vmem:[#allocation11 + $0xe0] sm:$0xff] %v723_v46  ;;  %756 = vst [vmem:[#allocation11 + $0xe8] sm:$0xff] %v724_v36  ;;  %v686_v55 = vpop.permute.xlu1 %685 }
 0x38c   :  { %v721_v62 = vmul.f32 %v686_v55, %v1415_v54  ;;  %v722_v38 = vmul.f32 %v686_v55, %v1416_v39 }
 0x38e   :  { %753 = vst [vmem:[#allocation11 + $0xd0] sm:$0xff] %v721_v62  ;;  %754 = vst [vmem:[#allocation11 + $0xd8] sm:$0xff] %v722_v38 }
 0x38f   :  { %v694_v63 = vpop.permute.xlu1 %693 }
 0x390   :  { %v725_v22 = vmul.f32 %v694_v63, %v1417_v23  ;;  %v726_v44 = vmul.f32 %v694_v63, %v1418_v3 }
 0x392   :  { %757 = vst [vmem:[#allocation11 + $0xf0] sm:$0xff] %v725_v22  ;;  %758 = vst [vmem:[#allocation11 + $0xf8] sm:$0xff] %v726_v44 }
 0x393   :  { %969 = shalt.err (!%p966_p2)
}
 0x394   :  { %s970_s9 = scalar_lea.hbm %s1382_s5, 4096 }
 0x395   :  { %p971_p3 = scmp.ne.s32.totalorder %s1382_s5, %s970_s9  ;;  %p974_p4 = scmp.lt.u32.totalorder %s970_s9, %s1382_s5 }
 0x397   :  { %p976_p5 = pnand %p974_p4, %p971_p3 }
 0x399   :  { %979 = shalt.err (!%p976_p5)
}
 0x39a   :  { %770 = dma.vmem_to_hbm [thread:$0]  %s765_s30, 4096, %s1382_s5, [#allocation4], %s993_s3, %s993_s3, %s994_s28  }
 0x39b   :  { %986 = dma.done.wait [#allocation4], 4096  }
 0x39c   :  { %987 = vsyncadd [#allocation4], 4294963200 }
 0x39d   :  { %774 = vsyncpa [#allocation3], 1 }
 0x39e   :  { %775 = vsyncpa [#allocation6], 1 }
 0x39f   :  { %776 = vsyncpa [#allocation9], 1 }
 0x3a0   :  { %777 = vsyncpa [#allocation4], 1 }

</bundles_post_ra>
